<compile_context>
chip_gen: v7x
topology: tpu7x:2x2x1
jax: 0.10.0
libtpu: 0.0.40
codegen_flags: <defaults>
</compile_context>

<pallas_src>
import jax
import jax.numpy as jnp
from jax.experimental import pallas as pl
from jax.experimental.pallas import tpu as pltpu


def _identity_copy_kernel(x_hbm_ref, o_hbm_ref, sem):
    # One whole-array HBM -> HBM DMA; no VMEM round-trip, no grid steps.
    cp = pltpu.make_async_copy(x_hbm_ref, o_hbm_ref, sem)
    cp.start()
    cp.wait()


def identity(x, *, force_kernel=False):
    """Pallas implementation of torch.nn.Identity forward: returns x unchanged.

    By default this is a true no-op (returns x).  Set force_kernel=True to run
    the pass-through as a single HBM->HBM DMA inside a Pallas kernel.
    """
    x = jnp.asarray(x)

    # Fast path (default): Identity is a no-op — any kernel launch is pure
    # overhead plus a full HBM read + write of the tensor.
    if not force_kernel or x.size == 0:
        return x

    return pl.pallas_call(
        _identity_copy_kernel,
        out_shape=jax.ShapeDtypeStruct(x.shape, x.dtype),
        in_specs=[pl.BlockSpec(memory_space=pl.ANY)],   # keep input in HBM
        out_specs=pl.BlockSpec(memory_space=pl.ANY),    # write output in HBM
        scratch_shapes=[pltpu.SemaphoreType.DMA],       # completion semaphore
    )(x)


if __name__ == "__main__":
    key = jax.random.PRNGKey(0)

    # Module-spec shape: default path — literally returns x.
    x = jax.random.normal(key, (2, 4, 16, 16), dtype=jnp.float32)
    y = identity(x)
    jax.block_until_ready(y)
    assert y.shape == x.shape and y.dtype == x.dtype
    assert bool(jnp.all(y == x))

    # Exercise the actual Pallas kernel path (whole-array HBM->HBM DMA).
    y_forced = identity(x, force_kernel=True)
    jax.block_until_ready(y_forced)
    assert y_forced.shape == x.shape and y_forced.dtype == x.dtype
    assert bool(jnp.all(y_forced == x))

    # Odd, non-(8,128)-friendly shape + sub-32-bit dtype: DMA path is
    # shape/dtype agnostic, so this must also work through the kernel.
    k2 = jax.random.split(key, 2)[1]
    x_odd = jax.random.normal(k2, (3, 5, 7), dtype=jnp.bfloat16)
    y_odd = identity(x_odd, force_kernel=True)
    jax.block_until_ready(y_odd)
    assert y_odd.shape == x_odd.shape and y_odd.dtype == x_odd.dtype
    assert bool(jnp.all(y_odd == x_odd))

    print("KERNEL_OK")
</pallas_src>

<mosaic_0001>
module attributes {stable_mosaic.version = 11 : i64} {
  func.func @_identity_copy_kernel(%arg0: memref<2x4x16x16xf32, #tpu.memory_space<any>>, %arg1: memref<2x4x16x16xf32, #tpu.memory_space<any>>, %arg2: memref<!tpu.dma_semaphore, #tpu.memory_space<semaphore_mem>>) attributes {dimension_semantics = [], scalar_prefetch = 0 : i64, scratch_operands = 1 : i64, tpu.core_type = #tpu.core_type<tc>} {
    tpu.enqueue_dma source(%arg0 : memref<2x4x16x16xf32, #tpu.memory_space<any>>) target(%arg1 : memref<2x4x16x16xf32, #tpu.memory_space<any>>) target_semaphore(%arg2 : memref<!tpu.dma_semaphore, #tpu.memory_space<semaphore_mem>>)
    tpu.wait_dma2 semaphore(%arg2 : memref<!tpu.dma_semaphore, #tpu.memory_space<semaphore_mem>>) src(%arg0 : memref<2x4x16x16xf32, #tpu.memory_space<any>>) dst(%arg1 : memref<2x4x16x16xf32, #tpu.memory_space<any>>)
    return
  }
}

</mosaic_0001>

<bundles_post_ra>
// kernel: tpu_custom_call.1
= control target key start
LH: loop header
LB: loop body
LE: loop exit
PB: predicated region body
PF: predicated region fallthrough
CT: control target
= control target key end

     0   :  { %s36_s6 = smov [#allocation2]   ;;  %s37_s7 = smov [#allocation3]   ;;  %s55_s0 = inlined_call_operand.hbm [shape: f32[2,4,16,16], index: 0, kind: input, shape index: {}]   ;;  %s56_s1 = inlined_call_operand.hbm [shape: f32[2,4,16,16], index: 1, kind: output, shape index: {}]  }
   0x1   :  { %s38_s8 = smov 0  }
   0x2   :  { %18 = dma.general %s55_s0, 2048, %s56_s1, %s36_s6, %s37_s7, [#allocation4], %s38_s8, 0  }
   0x3   :  { %34 = dma.done.wait [#allocation2], 2048 }
   0x4   :  { %35 = vsyncadd [#allocation2], 4294965248 }
   0x5   :  { %24 = vsyncmov [#allocation2] }
   0x8   :  { %s25_s13 = vpop.sfrf %24 }
   0x9   :  { %p30_p0 = scmp.ne.s32.totalorder %s25_s13, 0 }
   0xb   :  { %29 = shalt.err (%p30_p0)  }

</bundles_post_ra>
